<compile_context>
chip_gen: v6e
topology: v6e:2x2x1
jax: 0.10.0
libtpu: 0.0.40
codegen_flags: <defaults>
</compile_context>

<pallas_src>
import functools

import jax
import jax.numpy as jnp
from jax.experimental import pallas as pl
from jax.experimental.pallas import tpu as pltpu


def frn_kernel(x_ref, p_ref, o_ref, *, inv_hw, bf16_epilogue):
    # x_ref: (tm, HW)   p_ref: (tm, 4) f32 = [|eps|, gamma, beta, tau]
    x32 = x_ref[...].astype(jnp.float32)
    p = p_ref[...]
    eps_abs = p[:, 0:1]
    gamma = p[:, 1:2]
    beta = p[:, 2:3]
    tau = p[:, 3:4]
    # nu2 = mean(x^2) over the true spatial extent (block last dim == HW exactly).
    nu2 = jnp.sum(x32 * x32, axis=-1, keepdims=True) * inv_hw
    # Fold gamma into the per-row scale (saves one (tm,HW) VPU pass); rsqrt -> EUP.
    scale = gamma * jax.lax.rsqrt(nu2 + eps_abs)          # (tm, 1) f32
    if bf16_epilogue:
        # bf16 VALU epilogue (v6e/v7x): per-row params cast once, full-width math in bf16.
        y = jnp.maximum(
            x_ref[...] * scale.astype(jnp.bfloat16) + beta.astype(jnp.bfloat16),
            tau.astype(jnp.bfloat16),
        )
    else:
        y = jnp.maximum(x32 * scale + beta, tau)
    o_ref[...] = y.astype(o_ref.dtype)


def _round_up(v, m):
    return ((v + m - 1) // m) * m


def _vmem_capacity_bytes():
    """Per-TensorCore VMEM capacity; conservative (v7x = 64 MiB) fallback."""
    try:
        return int(pltpu.get_tpu_info().vmem_capacity_bytes)
    except Exception:
        return 64 << 20


def _choose_tm(nc, hw, itemsize, vmem_block_budget):
    """Row-tile size: ~8 MiB x blocks, clamped by the VMEM budget (double-
    buffered in + out blocks plus the lane-padded (tm,4) param block), with a
    preference for >=2 (even) grid steps so both v7x TensorCores get work."""
    sub = 16 if itemsize <= 2 else 8
    hw_lanes = _round_up(hw, 128)
    # VMEM bytes per block row: (in + out) x 2 buffers + params ((tm,4) f32
    # lane-pads to 128 lanes -> 512 B/row/buffer, x 2 buffers).
    per_row_bytes = 2 * 2 * hw_lanes * itemsize + 2 * 128 * 4
    tm_vmem = (vmem_block_budget // per_row_bytes) // sub * sub
    if tm_vmem < sub:
        # TODO(synk): add a two-pass 2-D grid (rows parallel, HW arbitrary with a
        # (tm,1) f32 sum(x^2) scratch) for huge spatial extents.
        raise ValueError(
            f"FRN spatial extent H*W={hw} too large for the single-pass kernel "
            f"(minimum tile needs {per_row_bytes * sub} bytes of VMEM)."
        )
    target_bytes = 8 << 20  # ~8 MiB x blocks (amortizes per-step overhead on v7x)
    tm_target = max(sub, (target_bytes // (hw_lanes * itemsize)) // sub * sub)
    nc_cap = _round_up(nc, sub)
    tm = min(tm_vmem, tm_target, nc_cap)
    # Prefer >=2 grid steps when rows allow (megacore balance on v7x).
    if nc_cap // tm < 2 and nc_cap >= 2 * sub:
        tm = max(sub, (nc_cap // 2) // sub * sub)
    # Best effort: even step count so both TensorCores get equal work.
    steps = -(-nc // tm)
    if steps > 1 and steps % 2 == 1:
        tm_alt = _round_up(-(-nc // (steps + 1)), sub)
        if sub <= tm_alt <= tm and (-(-nc // tm_alt)) % 2 == 0:
            tm = tm_alt
    if tm >= nc:
        tm = nc  # single full-extent block: legal block shape, no partial rows
    return tm


def frn_forward(x, eps, gamma, beta, tau, *, tm=None):
    """x: (N, C, H, W); eps/gamma/beta/tau: (1, C, 1, 1) — matches the PyTorch module."""
    N, C, H, W = x.shape
    NC, HW = N * C, H * W
    itemsize = jnp.dtype(x.dtype).itemsize
    sub = 16 if itemsize <= 2 else 8

    vmem_cap = _vmem_capacity_bytes()
    if tm is None:
        tm = _choose_tm(NC, HW, itemsize, int(vmem_cap * 0.6))

    x2d = x.reshape(NC, HW)  # contiguous reshape: free, no extra HBM pass

    # Pack |eps|, gamma, beta, tau into one per-row (NC, 4) f32 array
    # (single small DMA per grid step; |eps| precomputed so the kernel drops the abs).
    def per_row(p):
        return jnp.tile(p.reshape(C).astype(jnp.float32), (N,))

    packed = jnp.stack(
        [per_row(jnp.abs(eps)), per_row(gamma), per_row(beta), per_row(tau)],
        axis=1,
    )

    # VMEM limit from the real footprint (+ headroom), capped below capacity.
    hw_lanes = _round_up(HW, 128)
    tm_pad = _round_up(tm, sub)
    footprint = 2 * 2 * tm_pad * hw_lanes * itemsize + 2 * tm_pad * 128 * 4
    vmem_limit = max(16 << 20, min(footprint + (8 << 20), int(vmem_cap * 0.75)))

    grid = (pl.cdiv(NC, tm),)
    row_spec = pl.BlockSpec((tm, HW), lambda i: (i, 0))
    par_spec = pl.BlockSpec((tm, 4), lambda i: (i, 0))

    out2d = pl.pallas_call(
        functools.partial(
            frn_kernel,
            inv_hw=1.0 / HW,
            bf16_epilogue=(jnp.dtype(x.dtype) == jnp.dtype(jnp.bfloat16)),
        ),
        out_shape=jax.ShapeDtypeStruct((NC, HW), x.dtype),
        grid_spec=pltpu.PrefetchScalarGridSpec(
            num_scalar_prefetch=0,
            grid=grid,
            in_specs=[row_spec, par_spec],
            out_specs=row_spec,
        ),
        compiler_params=pltpu.CompilerParams(
            dimension_semantics=("parallel",),
            vmem_limit_bytes=int(vmem_limit),
        ),
    )(x2d, packed)

    return out2d.reshape(N, C, H, W)


def frn_reference(x, eps, gamma, beta, tau):
    xf = x.astype(jnp.float32)
    nu2 = jnp.mean(xf * xf, axis=(2, 3), keepdims=True)
    y = xf * jax.lax.rsqrt(nu2 + jnp.abs(eps))
    return jnp.maximum(gamma * y + beta, tau).astype(x.dtype)


if __name__ == "__main__":
    key = jax.random.PRNGKey(0)

    def make_params(C):
        # Deterministic init matching FRN.reset_parameters():
        # gamma = beta = tau = 1, eps = 1e-6 (non-learnable).
        shape = (1, C, 1, 1)
        eps = jnp.full(shape, 1e-6, dtype=jnp.float32)
        gamma = jnp.ones(shape, dtype=jnp.float32)
        beta = jnp.ones(shape, dtype=jnp.float32)
        tau = jnp.ones(shape, dtype=jnp.float32)
        return eps, gamma, beta, tau

    # Case 1: lane-aligned spatial size (16x16 = 256), f32.
    N, C, H, W = 2, 4, 16, 16
    x = jax.random.normal(key, (N, C, H, W), dtype=jnp.float32)
    eps, gamma, beta, tau = make_params(C)
    out = jax.block_until_ready(frn_forward(x, eps, gamma, beta, tau))
    ref = frn_reference(x, eps, gamma, beta, tau)
    assert out.shape == (N, C, H, W)
    assert jnp.allclose(out, ref, atol=1e-5, rtol=1e-5), "mismatch vs reference (aligned)"

    # Case 2: unaligned spatial size (14x14 = 196, no padding path) and NC=6 rows.
    N2, C2, H2, W2 = 2, 3, 14, 14
    x2 = jax.random.normal(jax.random.PRNGKey(1), (N2, C2, H2, W2), dtype=jnp.float32)
    eps2, gamma2, beta2, tau2 = make_params(C2)
    out2 = jax.block_until_ready(frn_forward(x2, eps2, gamma2, beta2, tau2))
    ref2 = frn_reference(x2, eps2, gamma2, beta2, tau2)
    assert out2.shape == (N2, C2, H2, W2)
    assert jnp.allclose(out2, ref2, atol=1e-5, rtol=1e-5), "mismatch vs reference (unaligned)"

    # Case 3: bf16 input exercises the bf16 epilogue path.
    N3, C3, H3, W3 = 2, 8, 16, 16
    x3 = jax.random.normal(jax.random.PRNGKey(2), (N3, C3, H3, W3), dtype=jnp.bfloat16)
    eps3, gamma3, beta3, tau3 = make_params(C3)
    out3 = jax.block_until_ready(frn_forward(x3, eps3, gamma3, beta3, tau3))
    ref3 = frn_reference(x3, eps3, gamma3, beta3, tau3)
    assert out3.shape == (N3, C3, H3, W3)
    assert jnp.allclose(out3.astype(jnp.float32), ref3.astype(jnp.float32),
                        atol=8e-2, rtol=5e-2), "mismatch vs reference (bf16)"

    print("KERNEL_OK")
</pallas_src>

<mosaic_0001>
module attributes {stable_mosaic.version = 11 : i64} {
  func.func @frn_kernel(%arg0: i32, %arg1: memref<8x256xf32, #tpu.memory_space<vmem>>, %arg2: memref<8x4xf32, #tpu.memory_space<vmem>>, %arg3: memref<8x256xf32, #tpu.memory_space<vmem>>) attributes {dimension_semantics = [#tpu.dimension_semantics<parallel>], iteration_bounds = array<i64: 1>, scalar_prefetch = 0 : i64, scratch_operands = 0 : i64, tpu.core_type = #tpu.core_type<tc>, window_params = [{transform_indices = @transform_0, window_bounds = array<i64: 8, 256>}, {transform_indices = @transform_1, window_bounds = array<i64: 8, 4>}, {transform_indices = @transform_2, window_bounds = array<i64: 8, 256>}]} {
    %c0 = arith.constant 0 : index
    %c0_0 = arith.constant 0 : index
    %0 = vector.load %arg1[%c0, %c0_0] : memref<8x256xf32, #tpu.memory_space<vmem>>, vector<8x256xf32>
    %c0_1 = arith.constant 0 : index
    %c0_2 = arith.constant 0 : index
    %1 = vector.load %arg2[%c0_1, %c0_2] : memref<8x4xf32, #tpu.memory_space<vmem>>, vector<8x4xf32>
    %2 = vector.extract_strided_slice %1 {offsets = [0, 0], sizes = [8, 1], strides = [1, 1]} : vector<8x4xf32> to vector<8x1xf32>
    %3 = vector.extract_strided_slice %1 {offsets = [0, 1], sizes = [8, 1], strides = [1, 1]} : vector<8x4xf32> to vector<8x1xf32>
    %4 = vector.extract_strided_slice %1 {offsets = [0, 2], sizes = [8, 1], strides = [1, 1]} : vector<8x4xf32> to vector<8x1xf32>
    %5 = vector.extract_strided_slice %1 {offsets = [0, 3], sizes = [8, 1], strides = [1, 1]} : vector<8x4xf32> to vector<8x1xf32>
    %6 = arith.mulf %0, %0 : vector<8x256xf32>
    %cst = arith.constant dense<0.000000e+00> : vector<8xf32>
    %7 = vector.multi_reduction <add>, %6, %cst [1] : vector<8x256xf32> to vector<8xf32>
    %8 = vector.shape_cast %7 : vector<8xf32> to vector<8x1xf32>
    %cst_3 = arith.constant 3.906250e-03 : f32
    %9 = vector.broadcast %cst_3 : f32 to vector<8x1xf32>
    %10 = arith.mulf %8, %9 : vector<8x1xf32>
    %11 = arith.addf %10, %2 : vector<8x1xf32>
    %12 = math.rsqrt %11 : vector<8x1xf32>
    %13 = arith.mulf %3, %12 : vector<8x1xf32>
    %14 = vector.broadcast %13 : vector<8x1xf32> to vector<8x256xf32>
    %15 = arith.mulf %0, %14 : vector<8x256xf32>
    %16 = vector.broadcast %4 : vector<8x1xf32> to vector<8x256xf32>
    %17 = arith.addf %15, %16 : vector<8x256xf32>
    %18 = vector.broadcast %5 : vector<8x1xf32> to vector<8x256xf32>
    %19 = arith.maximumf %17, %18 : vector<8x256xf32>
    %c0_4 = arith.constant 0 : index
    %c0_5 = arith.constant 0 : index
    %20 = vector.load %arg3[%c0_4, %c0_5] : memref<8x256xf32, #tpu.memory_space<vmem>>, vector<8x256xf32>
    tpu.vector_store %arg3[%c0_4, %c0_5], %19 {strides = array<i32>} : memref<8x256xf32, #tpu.memory_space<vmem>>, vector<8x256xf32>,
    return
  }
  func.func @transform_0(%arg0: i32) -> (i32, i32) {
    %c0_i32 = arith.constant 0 : i32
    %c0_i32_0 = arith.constant 0 : i32
    return %arg0, %c0_i32 : i32, i32
  }
  func.func @transform_1(%arg0: i32) -> (i32, i32) {
    %c0_i32 = arith.constant 0 : i32
    %c0_i32_0 = arith.constant 0 : i32
    return %arg0, %c0_i32 : i32, i32
  }
  func.func @transform_2(%arg0: i32) -> (i32, i32) {
    %c0_i32 = arith.constant 0 : i32
    %c0_i32_0 = arith.constant 0 : i32
    return %arg0, %c0_i32 : i32, i32
  }
}

</mosaic_0001>

<bundles_post_ra>
// kernel: tpu_custom_call.1
= control target key start
LH: loop header
LB: loop body
LE: loop exit
PB: predicated region body
PF: predicated region fallthrough
CT: control target
= control target key end

     0   :  { %7 = vsyncpa [#allocation3], 0  ;;  %s163_s0 = inlined_call_operand.hbm [shape: f32[8,256], index: 0, kind: input, shape index: {}]   ;;  %s164_s1 = inlined_call_operand.vmem [shape: f32[8,4], index: 1, kind: input, shape index: {}]   ;;  %s165_s2 = inlined_call_operand.hbm [shape: f32[8,256], index: 2, kind: output, shape index: {}]  }
   0x1   :  { %8 = vsyncpa [#allocation4], 0  ;;  %s133_s9 = smov [#allocation2]  }
   0x2   :  { %s15_s10 = sshll.u32 %s133_s9, 4  ;;  %s16_s10 = int_to_ptr.vmem [resolvable:$true] %s15_s10 }
   0x3   :  { %s97_s11 = scalar_lea.vmem %s16_s10, 256  ;;  %p102_p1 = scmp.lt.s32.totalorder %s16_s10, %s16_s10 }
   0x4   :  { %p98_p0 = scmp.ne.s32.totalorder %s16_s10, %s97_s11  ;;  %p103_p2 = scmp.lt.s32.totalorder %s97_s11, %s97_s11 }
   0x6   :  { %p104_p3 = por %p103_p2, %p102_p1 }
   0x8   :  { %p105_p4 = pnand %p104_p3, %p98_p0 }
   0xa   :  { %108 = shalt.err (!%p105_p4)
}
   0xb   :  { %18 = dma.hbm_to_vmem [thread:$0]  %s163_s0, 256, %s16_s10, [#allocation3]  }
   0xc   :  { %129 = dma.done.wait [#allocation3], 256  }
   0xd   :  { %130 = vsyncadd [#allocation3], 4294967040  ;;  %v24_v0 = vld [vmem:[#allocation2] sm:$0xff]  ;;  %v25_v1 = vld [vmem:[#allocation2 + $0x8] sm:$0xff]  ;;  %v134_v6 = vmov 2   ;;  %v135_v10 = vmov 1  }
   0xe   :  { %v27_v2 = vmul.f32 %v24_v0, %v24_v0  ;;  %v28_v3 = vmul.f32 %v25_v1, %v25_v1  ;;  %v26_v5 = vld [vmem:[%s164_s1] sm:$0xff]  ;;  %83 = vset.pattern.permute.xlu1 %v134_v6  ;;  %v136_v11 = vmov 3   ;;  %s137_s0 = smov 1   ;;  %s138_s1 = smov [#allocation5]  }
   0xf   :  { %49 = vperm.xlu1 %83, %v26_v5   ;;  %86 = vset.pattern.permute.xlu0 %v136_v11  ;;  %s68_s16 = sshll.u32 %s138_s1, 4  ;;  %s69_s16 = int_to_ptr.vmem [resolvable:$true] %s68_s16 }
  0x10   :  { %v29_v4 = vadd.f32 %v28_v3, %v27_v2  ;;  %s109_s17 = scalar_lea.vmem %s69_s16, 256  ;;  %p114_p6 = scmp.lt.s32.totalorder %s69_s16, %s69_s16 }
  0x11   :  { %p110_p5 = scmp.ne.s32.totalorder %s69_s16, %s109_s17  ;;  %p115_p7 = scmp.lt.s32.totalorder %s109_s17, %s109_s17 }
  0x12   :  { %30 = vadd.xlane.f32.xlu0 %v29_v4 }
  0x13   :  { %84 = vset.pattern.permute.xlu1 %v135_v10  ;;  %p116_p8 = por %p115_p7, %p114_p6 }
  0x15   :  { %p117_p9 = pnand %p116_p8, %p110_p5 }
  0x8a   :  { %v50_v15 = vpop.permute.xlu1 %49 }
  0x9b   :  { %v31_v7 = vpop.xlane.xlu0 %30 }
  0x9c   :  { %v32_v8 = vmul.f32 0.00390625, %v31_v7 }
  0x9e   :  { %v33_v9 = vadd.f32 %v32_v8, %v26_v5 }
  0xa0   :  { %87 = vrsqrt.f32 %v33_v9 }
  0xad   :  { %v88_v12 = vpop.eup %87 }
  0xae   :  { %36 = vrot.lane.b32.xlu0 %v88_v12, %s137_s0 }
 0x120   :  { %v37_v13 = vpop.permute.xlu0 %36 }
 0x121   :  { %v39_v14 = vmul.f32 %v37_v13, %v26_v5 }
 0x123   :  { %42 = vperm.xlu1 %84, %v39_v14  }
 0x127   :  { %85 = vset.pattern.permute.xlu1 %v136_v11 }
 0x128   :  { %55 = vperm.xlu1 %85, %v26_v5  }
 0x19e   :  { %v43_v16 = vpop.permute.xlu1 %42 }
 0x19f   :  { %v45_v17 = vmul.f32 %v43_v16, %v24_v0  ;;  %v46_v18 = vmul.f32 %v43_v16, %v25_v1 }
 0x1a1   :  { %v52_v19 = vadd.f32 %v50_v15, %v45_v17  ;;  %v53_v20 = vadd.f32 %v50_v15, %v46_v18 }
 0x1a3   :  { %v56_v21 = vpop.permute.xlu1 %55 }
 0x1a4   :  { %v58_v22 = vmax.f32 %v52_v19, %v56_v21  ;;  %v59_v23 = vmax.f32 %v53_v20, %v56_v21 }
 0x1a6   :  { %60 = vst [vmem:[#allocation5] sm:$0xff] %v58_v22  ;;  %61 = vst [vmem:[#allocation5 + $0x8] sm:$0xff] %v59_v23 }
 0x1a7   :  { %120 = shalt.err (!%p117_p9)
}
 0x1a8   :  { %71 = dma.vmem_to_hbm [thread:$0]  %s69_s16, 256, %s165_s2, [#allocation4]  }
 0x1a9   :  { %131 = dma.done.wait [#allocation4], 256  }
 0x1aa   :  { %132 = vsyncadd [#allocation4], 4294967040 }
 0x1ab   :  { %75 = vsyncpa [#allocation3], 1 }
 0x1ac   :  { %76 = vsyncpa [#allocation4], 1 }

</bundles_post_ra>
